<compile_context>
chip_gen: v7x
topology: tpu7x:2x2x1
jax: 0.10.0
libtpu: 0.0.40
codegen_flags: <defaults>
</compile_context>

<pallas_src>
import numpy as np
import jax
import jax.numpy as jnp
from jax.experimental import pallas as pl
from jax.experimental.pallas import tpu as pltpu


def _round_up(a: int, b: int) -> int:
    return (a + b - 1) // b * b


def _dft_weight(n: int, rows_pad: int) -> np.ndarray:
    """Real DFT matrix W of shape (rows_pad, n), rows_pad >= 2*(n//2+1).

    W[:K]    =  cos(2*pi*k*m/n)   -> real part of rfft
    W[K:2K]  = -sin(2*pi*k*m/n)   -> imag part of rfft
    Rows [2K:rows_pad] are zero padding (sliced off by the wrapper).
    """
    k = np.arange(n // 2 + 1)[:, None].astype(np.float64)
    m = np.arange(n)[None, :].astype(np.float64)
    ang = 2.0 * np.pi * k * m / float(n)
    w = np.concatenate([np.cos(ang), -np.sin(ang)], axis=0)  # (2K, n)
    if rows_pad > w.shape[0]:
        w = np.pad(w, ((0, rows_pad - w.shape[0]), (0, 0)))
    return w.astype(np.float32)


def _fft_kernel(w_ref, x_ref, o_ref):
    # w_ref: (K2_pad, tk)   DFT-matrix slab (contraction tile k)
    # x_ref: (tk, TN)       input slab; lanes = flattened (batch, feature)
    # o_ref: (K2_pad, TN)   f32 output tile, resident across the k axis
    @pl.when(pl.program_id(1) == 0)
    def _init():
        o_ref[...] = jnp.zeros_like(o_ref)

    o_ref[...] += jnp.dot(
        w_ref[...], x_ref[...], preferred_element_type=jnp.float32
    )


def fft_layer(
    x: jnp.ndarray,
    *,
    compute_dtype=jnp.bfloat16,   # bf16 single-pass MXU; use f32 for strict accuracy
    lane_tile: int = 256,         # 256 for v6e/v7x MXU width; clamps to 128 when small
    k_tile: int = 512,            # contraction tile once N is large
) -> jnp.ndarray:
    """Pallas equivalent of _FFTLayer.forward for x of shape (B, N, D)."""
    B, N, D = x.shape
    K2 = 2 * (N // 2 + 1)
    K2_pad = _round_up(K2, 8)                       # sublane-aligned rows

    # Fold batch into the lane axis: (B, N, D) -> (N, B*D), pad lanes.
    M = B * D
    lane_tile = min(lane_tile, _round_up(M, 128))   # don't over-tile tiny lane counts
    M_pad = _round_up(M, lane_tile)

    # Contraction tiling: full N when small, else stream 512-wide slabs of W.
    if N <= k_tile:
        tk, N_pad = N, N
    else:
        tk, N_pad = k_tile, _round_up(N, k_tile)

    w = _dft_weight(N, K2_pad)                      # (K2_pad, N) f32
    if N_pad > N:
        w = np.pad(w, ((0, 0), (0, N_pad - N)))
    w = jnp.asarray(w, dtype=compute_dtype)

    x_t = jnp.transpose(x, (1, 0, 2)).reshape(N, M)  # (N, B*D)
    x_t = jnp.pad(x_t, ((0, N_pad - N), (0, M_pad - M))).astype(compute_dtype)

    grid = (M_pad // lane_tile, N_pad // tk)         # (parallel lanes, reduction)

    itemsize = jnp.dtype(compute_dtype).itemsize
    cost = pl.CostEstimate(
        flops=int(2 * K2_pad * N_pad * M_pad),
        transcendentals=0,
        bytes_accessed=int(
            itemsize * (K2_pad * N_pad + N_pad * M_pad) + 4 * K2_pad * M_pad
        ),
    )

    out = pl.pallas_call(
        _fft_kernel,
        out_shape=jax.ShapeDtypeStruct((K2_pad, M_pad), jnp.float32),
        grid_spec=pltpu.PrefetchScalarGridSpec(
            num_scalar_prefetch=0,
            grid=grid,
            in_specs=[
                pl.BlockSpec((K2_pad, tk), lambda j, k: (0, k)),        # W slab
                pl.BlockSpec((tk, lane_tile), lambda j, k: (k, j)),     # X slab
            ],
            out_specs=pl.BlockSpec((K2_pad, lane_tile), lambda j, k: (0, j)),
        ),
        compiler_params=pltpu.CompilerParams(
            dimension_semantics=("parallel", "arbitrary"),
            vmem_limit_bytes=48 * 1024 * 1024,
        ),
        cost_estimate=cost,
    )(w, x_t)

    # (K2_pad, M_pad) -> strip padding -> (B, 2K, D)
    out = out[:K2, :M].reshape(K2, B, D).transpose(1, 0, 2)
    return out


if __name__ == "__main__":
    key = jax.random.PRNGKey(0)
    B, N, D = 2, 8, 32            # batch=2, fft length=8, hidden=32
    x = jax.random.normal(key, (B, N, D), dtype=jnp.float32)

    out = jax.block_until_ready(fft_layer(x))

    # Reference (same semantics as the PyTorch module, via jnp.fft.rfft).
    ref_c = jnp.fft.rfft(x, axis=1)
    ref = jnp.concatenate([ref_c.real, ref_c.imag], axis=1).astype(jnp.float32)

    assert out.shape == ref.shape, (out.shape, ref.shape)
    # Kernel uses bf16 MXU inputs with f32 accumulation -> tolerance sized for
    # bf16 rounding of the DFT sum (error grows ~sqrt(N); N=8 here).
    err = float(jnp.max(jnp.abs(out - ref)))
    assert jnp.allclose(out, ref, atol=5e-2, rtol=5e-2), err
    print("KERNEL_OK")
</pallas_src>

<mosaic_0001>
module attributes {stable_mosaic.version = 11 : i64} {
  func.func @_fft_kernel(%arg0: i32, %arg1: i32, %arg2: memref<16x8xbf16, #tpu.memory_space<vmem>>, %arg3: memref<8x128xbf16, #tpu.memory_space<vmem>>, %arg4: memref<16x128xf32, #tpu.memory_space<vmem>>) attributes {dimension_semantics = [#tpu.dimension_semantics<parallel>, #tpu.dimension_semantics<arbitrary>], iteration_bounds = array<i64: 1, 1>, scalar_prefetch = 0 : i64, scratch_operands = 0 : i64, tpu.core_type = #tpu.core_type<tc>, window_params = [{transform_indices = @transform_0, window_bounds = array<i64: 16, 8>}, {transform_indices = @transform_1, window_bounds = array<i64: 8, 128>}, {transform_indices = @transform_2, window_bounds = array<i64: 16, 128>}]} {
    %c0_i32 = arith.constant 0 : i32
    %0 = arith.cmpi eq, %arg1, %c0_i32 : i32
    %1 = arith.extui %0 : i1 to i32
    %c0_i32_0 = arith.constant 0 : i32
    %2 = arith.cmpi ne, %1, %c0_i32_0 : i32
    scf.if %2 {
      %cst_8 = arith.constant 0.000000e+00 : f32
      %9 = vector.broadcast %cst_8 : f32 to vector<16x128xf32>
      %c0_9 = arith.constant 0 : index
      %c0_10 = arith.constant 0 : index
      %10 = vector.load %arg4[%c0_9, %c0_10] : memref<16x128xf32, #tpu.memory_space<vmem>>, vector<16x128xf32>
      tpu.vector_store %arg4[%c0_9, %c0_10], %9 {strides = array<i32>} : memref<16x128xf32, #tpu.memory_space<vmem>>, vector<16x128xf32>,
    } else {
    }
    %c0 = arith.constant 0 : index
    %c0_1 = arith.constant 0 : index
    %3 = vector.load %arg4[%c0, %c0_1] : memref<16x128xf32, #tpu.memory_space<vmem>>, vector<16x128xf32>
    %c0_2 = arith.constant 0 : index
    %c0_3 = arith.constant 0 : index
    %4 = vector.load %arg2[%c0_2, %c0_3] : memref<16x8xbf16, #tpu.memory_space<vmem>>, vector<16x8xbf16>
    %c0_4 = arith.constant 0 : index
    %c0_5 = arith.constant 0 : index
    %5 = vector.load %arg3[%c0_4, %c0_5] : memref<8x128xbf16, #tpu.memory_space<vmem>>, vector<8x128xbf16>
    %cst = arith.constant dense<0.000000e+00> : vector<16x128xf32>
    %6 = tpu.matmul %4, %5, %cst {dimension_numbers = #tpu.dot_dimension_numbers<[1], [0], [0], [1], [0, 0, 1, 1], [], []>} : vector<16x8xbf16>, vector<8x128xbf16>, vector<16x128xf32> -> vector<16x128xf32>
    %7 = arith.addf %3, %6 : vector<16x128xf32>
    %c0_6 = arith.constant 0 : index
    %c0_7 = arith.constant 0 : index
    %8 = vector.load %arg4[%c0_6, %c0_7] : memref<16x128xf32, #tpu.memory_space<vmem>>, vector<16x128xf32>
    tpu.vector_store %arg4[%c0_6, %c0_7], %7 {strides = array<i32>} : memref<16x128xf32, #tpu.memory_space<vmem>>, vector<16x128xf32>,
    return
  }
  func.func @transform_0(%arg0: i32, %arg1: i32) -> (i32, i32) {
    %c0_i32 = arith.constant 0 : i32
    %c0_i32_0 = arith.constant 0 : i32
    return %c0_i32, %arg1 : i32, i32
  }
  func.func @transform_1(%arg0: i32, %arg1: i32) -> (i32, i32) {
    %c0_i32 = arith.constant 0 : i32
    return %arg1, %arg0 : i32, i32
  }
  func.func @transform_2(%arg0: i32, %arg1: i32) -> (i32, i32) {
    %c0_i32 = arith.constant 0 : i32
    %c0_i32_0 = arith.constant 0 : i32
    return %c0_i32, %arg0 : i32, i32
  }
}

</mosaic_0001>

<bundles_post_ra>
// kernel: tpu_custom_call.1
= control target key start
LH: loop header
LB: loop body
LE: loop exit
PB: predicated region body
PF: predicated region fallthrough
CT: control target
= control target key end

     0   :  { %vm33_vm0 = vcmask 1043456   ;;  %v138_v1 = vmov 0.0   ;;  %vm139_vm1 = vmmov 0   ;;  %vm29_vm2 = vcmask 64512   ;;  %s176_s0 = inlined_call_operand.vmem [shape: bf16[16,8], index: 0, kind: input, shape index: {}]   ;;  %s177_s1 = inlined_call_operand.vmem [shape: bf16[8,128], index: 1, kind: input, shape index: {}]   ;;  %s178_s2 = inlined_call_operand.hbm [shape: f32[16,128], index: 2, kind: output, shape index: {}]  }
   0x1   :  { %v23_v0 = vld [vmem:[%s177_s1] sm:$0xf]  ;;  %102 = vmatprep.subr.bf16.mxu0 %v138_v1  ;;  %104 = vmatprep.mubr.msk.bf16.mxu0 %vm139_vm1, %v138_v1 }
   0x2   :  { %v35_v2 = vsel %vm33_vm0, %v23_v0, 0  ;;  %v113_v3 = vld [vmem:[%s176_s0] sm:$0xff]  }
   0x3   :  { %103 = vmatpush3.bf16.msra.mxu0 %v35_v2 }
   0x4   :  { %7 = vsyncpa [#allocation3], 0  ;;  %s140_s13 = smov [#allocation2]  }
   0x5   :  { %s87_s14 = sshll.u32 %s140_s13, 4  ;;  %s88_s14 = int_to_ptr.vmem [resolvable:$true] %s87_s14 }
   0x6   :  { %105 = vmatmul.mubr.msk.bf16.vlgmr.msra.gmra.mrb[0].mxu0 %vm29_vm2, %v113_v3  ;;  %s114_s1 = scalar_lea.vmem %s88_s14, 256  ;;  %p119_p1 = scmp.lt.s32.totalorder %s88_s14, %s88_s14 }
   0x7   :  { %p115_p0 = scmp.ne.s32.totalorder %s88_s14, %s114_s1  ;;  %p120_p2 = scmp.lt.s32.totalorder %s114_s1, %s114_s1 }
   0x9   :  { %p121_p3 = por %p120_p2, %p119_p1 }
   0xb   :  { %p122_p4 = pnand %p121_p3, %p115_p0 }
  0xd9   :  { %v71_v4 = vpop.f32.mrb[0].mxu0 }
  0xda   :  { %v106_v5 = vpop.f32.mrb[1].mxu0  ;;  %80 = vst [vmem:[#allocation2] sm:$0xff] %v71_v4 }
  0xdb   :  { %v74_v6 = vpop.f32.mrb[2].mxu0 }
  0xdc   :  { %v107_v7 = vpop.f32.mrb[3].mxu0  ;;  %81 = vst [vmem:[#allocation2 + $0x8] sm:$0xff] %v74_v6 }
  0xdd   :  { %125 = shalt.err (!%p122_p4)
}
  0xde   :  { %s126_s16 = scalar_lea.hbm %s178_s2, 256 }
  0xdf   :  { %p127_p5 = scmp.ne.s32.totalorder %s178_s2, %s126_s16  ;;  %p130_p6 = scmp.lt.u32.totalorder %s126_s16, %s178_s2 }
  0xe1   :  { %p132_p7 = pnand %p130_p6, %p127_p5 }
  0xe3   :  { %135 = shalt.err (!%p132_p7)
}
  0xe4   :  { %s141_s21 = smov 128   ;;  %s142_s22 = smov 8  }
  0xe5   :  { %93 = dma.vmem_to_hbm [thread:$0]  %s88_s14, 256, %s178_s2, [#allocation3], %s141_s21, %s141_s21, %s142_s22  }
  0xe6   :  { %136 = dma.done.wait [#allocation3], 256  }
  0xe7   :  { %137 = vsyncadd [#allocation3], 4294967040 }
  0xe8   :  { %97 = vsyncpa [#allocation3], 1 }

</bundles_post_ra>
